<compile_context>
chip_gen: v7x
topology: tpu7x:2x2x1
jax: 0.10.0
libtpu: 0.0.40
codegen_flags: <defaults>
</compile_context>

<pallas_src>
import jax
import jax.numpy as jnp
from jax.experimental import pallas as pl
from jax.experimental.pallas import tpu as pltpu


# ----------------------------------------------------------------------------
# Kernels
# ----------------------------------------------------------------------------
def _cond_kernel_bf16(x_ref, w_ref, b_ref, o_ref):
    # x_ref: (TM, D) f32, w_ref: (D, TN) bf16, b_ref: (1, TN) f32, o_ref: (TM, TN)
    x = x_ref[...].astype(jnp.float32)
    s = x * jax.nn.sigmoid(x)                               # SiLU in f32 (VPU+EUP)
    y = jnp.dot(s.astype(w_ref.dtype), w_ref[...],
                preferred_element_type=jnp.float32)         # MXU, f32 accumulate
    o_ref[...] = (y + b_ref[...]).astype(o_ref.dtype)


def _cond_kernel_int8(x_ref, w_ref, sc_ref, b_ref, o_ref):
    # int8 weight streaming; dequant (per-output-channel scale) in f32 epilogue.
    x = x_ref[...].astype(jnp.float32)
    s = x * jax.nn.sigmoid(x)
    w = w_ref[...].astype(jnp.bfloat16)                     # i8 -> bf16 (exact)
    y = jnp.dot(s.astype(jnp.bfloat16), w,
                preferred_element_type=jnp.float32)
    o_ref[...] = (y * sc_ref[...] + b_ref[...]).astype(o_ref.dtype)


# ----------------------------------------------------------------------------
# Planning / parameter prep (one-time, outside the hot forward)
# ----------------------------------------------------------------------------
def _round_up(x, m):
    return (x + m - 1) // m * m


def _cdiv(a, b):
    return (a + b - 1) // b


def plan_cond_tiles(d_model, out_dim, *, w_bytes=2, out_bytes=4, x_bytes=4,
                    tm_cap=256, tn_max=4096, vmem_budget=40 << 20):
    """Pick the OUT tile width from an explicit VMEM budget.

    Double-buffered footprint: 2*tm*D*x + 2*D*tn*w + 2*tm*tn*out + bias rows.
    Independent of the actual batch (tm is capped at tm_cap and chosen per
    call), so the padded weight layout can be prepared once.
    """
    assert tm_cap % 8 == 0 and tn_max >= 128
    D = d_model
    U = _cdiv(out_dim, 128)                       # OUT size in 128-lane units
    fixed = 2 * tm_cap * D * x_bytes              # activation double-buffer
    avail = max(vmem_budget - fixed, 2 << 20)
    per_col = 2 * D * w_bytes + 2 * tm_cap * out_bytes + 128   # + bias/scale rows
    c_cap = max(min(avail // per_col // 128, tn_max // 128), 1)
    nj = _cdiv(U, c_cap)
    if U >= 2:
        nj = max(nj, 2)                           # >= 2 OUT tiles -> v7x megacore
    tn = _cdiv(U, nj) * 128
    out_p = nj * tn                               # pad OUT up to nj * tn
    return dict(d_model=D, out_dim=out_dim, out_p=out_p, tn=tn, nj=nj,
                tm_cap=tm_cap, w_bytes=w_bytes)


def prepare_cond_params(weight, bias, plan, *, weight_dtype=jnp.bfloat16,
                        int8_weights=False):
    """One-time prep: transpose from torch (OUT, D) layout, pad to OUT_p, cast.

    Returns weight_p (D, OUT_p) in the streaming dtype, bias_p (1, OUT_p) f32,
    and (int8 path) per-output-channel scale_p (1, OUT_p) f32.
    """
    D, OUT, OUT_p = plan["d_model"], plan["out_dim"], plan["out_p"]
    assert weight.shape == (OUT, D) and bias.shape == (OUT,)
    w = jnp.asarray(weight, jnp.float32).T                       # (D, OUT)
    w = jnp.pad(w, ((0, 0), (0, OUT_p - OUT)))
    b = jnp.pad(jnp.asarray(bias, jnp.float32), (0, OUT_p - OUT)).reshape(1, OUT_p)
    if int8_weights:
        amax = jnp.max(jnp.abs(w), axis=0)                       # per out channel
        scale = jnp.where(amax > 0, amax / 127.0, 1.0).astype(jnp.float32)
        q = jnp.round(w / scale[None, :]).astype(jnp.int8)
        return dict(weight_p=q, bias_p=b, scale_p=scale.reshape(1, OUT_p), int8=True)
    return dict(weight_p=w.astype(weight_dtype), bias_p=b, scale_p=None, int8=False)


# ----------------------------------------------------------------------------
# Hot forward
# ----------------------------------------------------------------------------
def cond_model_forward(cond, params, plan, *, out_dtype=None):
    """Computes silu(cond) @ W^T + b, returning (B, OUT)."""
    B, D = cond.shape
    assert D == plan["d_model"]
    OUT, OUT_p, tn, nj = plan["out_dim"], plan["out_p"], plan["tn"], plan["nj"]
    w, b, int8 = params["weight_p"], params["bias_p"], params["int8"]
    assert w.shape == (D, OUT_p)
    out_dtype = cond.dtype if out_dtype is None else out_dtype

    tm = min(_round_up(B, 8), plan["tm_cap"])
    ni = _cdiv(_round_up(B, 8), tm)
    B_p = ni * tm
    if B_p != B:
        cond = jnp.pad(cond, ((0, B_p - B), (0, 0)))     # small (B, D) pad only

    # OUT tiles OUTER, batch tiles INNER: weight tile (0, j) is resident across
    # the inner batch sweep -> weight streamed from HBM exactly once.
    grid = (nj, ni)

    in_specs = [
        pl.BlockSpec((tm, D), lambda j, i: (i, 0)),      # activations
        pl.BlockSpec((D, tn), lambda j, i: (0, j)),      # streamed weight tile
    ]
    args = [cond, w]
    if int8:
        in_specs.append(pl.BlockSpec((1, tn), lambda j, i: (0, j)))   # scales
        args.append(params["scale_p"])
    in_specs.append(pl.BlockSpec((1, tn), lambda j, i: (0, j)))       # bias
    args.append(b)

    kernel = _cond_kernel_int8 if int8 else _cond_kernel_bf16

    # Explicit VMEM budget (v7x has only 64 MiB physical; v5e default scoped
    # limit is 16 MiB) derived from the double-buffered tile footprint.
    w_bytes = w.dtype.itemsize
    out_bytes = jnp.dtype(out_dtype).itemsize
    vmem_need = (2 * tm * D * 4 + 2 * D * tn * w_bytes + 2 * tm * tn * out_bytes
                 + (4 if int8 else 2) * 8 * tn * 4)
    vmem_limit = int(min(max(vmem_need + (8 << 20), 16 << 20), 48 << 20))

    x_passes = 1 if ni == 1 else nj                      # x re-read per OUT tile
    cost = pl.CostEstimate(
        flops=2 * B_p * D * OUT_p,
        transcendentals=B_p * D * nj,                    # sigmoid per OUT tile
        bytes_accessed=(D * OUT_p * w_bytes              # weight streamed once
                        + x_passes * B_p * D * 4
                        + OUT_p * 4 * (2 if int8 else 1)
                        + B_p * OUT_p * out_bytes),
    )

    out = pl.pallas_call(
        kernel,
        out_shape=jax.ShapeDtypeStruct((B_p, OUT_p), out_dtype),
        grid_spec=pltpu.PrefetchScalarGridSpec(
            num_scalar_prefetch=0,
            grid=grid,
            in_specs=in_specs,
            out_specs=pl.BlockSpec((tm, tn), lambda j, i: (i, j)),
        ),
        compiler_params=pltpu.CompilerParams(
            dimension_semantics=("parallel", "parallel"),
            vmem_limit_bytes=vmem_limit),
        cost_estimate=cost,
    )(*args)

    return out[:B, :OUT]


# ----------------------------------------------------------------------------
# Reference (same mixed precision as the kernel paths)
# ----------------------------------------------------------------------------
def cond_model_reference(cond, params, plan):
    OUT = plan["out_dim"]
    x = cond.astype(jnp.float32)
    s = x * jax.nn.sigmoid(x)
    if params["int8"]:
        s = s.astype(jnp.bfloat16).astype(jnp.float32)
        w = params["weight_p"].astype(jnp.float32) * params["scale_p"]
    else:
        s = s.astype(params["weight_p"].dtype).astype(jnp.float32)
        w = params["weight_p"].astype(jnp.float32)
    return (s @ w + params["bias_p"])[:, :OUT]


if __name__ == "__main__":
    # Small shapes consistent with the module: first_nhop_condModel takes the
    # (B, d_model) conditioning vector and emits 6 * d_model * num_layers
    # adaLN parameters (production: d_model=768, num_layers=12 -> OUT=55296).
    d_model = 64
    num_layers = 3
    batch = 16
    out_dim = 6 * d_model * num_layers            # 1152 = 9 * 128

    key = jax.random.PRNGKey(0)
    k_x, k_w, k_b = jax.random.split(key, 3)
    cond = jax.random.normal(k_x, (batch, d_model), dtype=jnp.float32)
    # torch nn.Linear layout: weight (OUT, D), bias (OUT,).  reset_parameters()
    # would zero these; use small random values to actually exercise the path.
    weight = 0.02 * jax.random.normal(k_w, (out_dim, d_model), dtype=jnp.float32)
    bias = 0.02 * jax.random.normal(k_b, (out_dim,), dtype=jnp.float32)

    # --- default bf16 weight-streaming path ---------------------------------
    plan = plan_cond_tiles(d_model, out_dim, w_bytes=2)
    params = prepare_cond_params(weight, bias, plan)            # one-time prep
    out = jax.block_until_ready(cond_model_forward(cond, params, plan))
    ref = cond_model_reference(cond, params, plan)
    assert out.shape == (batch, out_dim)
    assert jnp.allclose(out, ref, atol=1e-4, rtol=1e-4), "bf16 path mismatch"

    # --- batch-tiled path (weight stays resident across inner batch tiles) --
    plan_bt = plan_cond_tiles(d_model, out_dim, w_bytes=2, tm_cap=8)
    params_bt = prepare_cond_params(weight, bias, plan_bt)
    out_bt = jax.block_until_ready(cond_model_forward(cond, params_bt, plan_bt))
    assert jnp.allclose(out_bt, ref, atol=1e-4, rtol=1e-4), "batch-tiled mismatch"

    # --- int8 weight path (per-output-channel scales; v5e/v6e BW saver) -----
    plan_q = plan_cond_tiles(d_model, out_dim, w_bytes=1)
    params_q = prepare_cond_params(weight, bias, plan_q, int8_weights=True)
    out_q = jax.block_until_ready(cond_model_forward(cond, params_q, plan_q))
    ref_q = cond_model_reference(cond, params_q, plan_q)
    assert jnp.allclose(out_q, ref_q, atol=2e-3, rtol=2e-3), "int8 path mismatch"

    print("KERNEL_OK")
</pallas_src>

<mosaic_0001>
module attributes {stable_mosaic.version = 11 : i64} {
  func.func @_cond_kernel_bf16(%arg0: i32, %arg1: i32, %arg2: memref<16x64xf32, #tpu.memory_space<vmem>>, %arg3: memref<64x640xbf16, #tpu.memory_space<vmem>>, %arg4: memref<1x640xf32, #tpu.memory_space<vmem>>, %arg5: memref<16x640xf32, #tpu.memory_space<vmem>>) attributes {dimension_semantics = [#tpu.dimension_semantics<parallel>, #tpu.dimension_semantics<parallel>], iteration_bounds = array<i64: 2, 1>, scalar_prefetch = 0 : i64, scratch_operands = 0 : i64, tpu.core_type = #tpu.core_type<tc>, window_params = [{transform_indices = @transform_0, window_bounds = array<i64: 16, 64>}, {transform_indices = @transform_1, window_bounds = array<i64: 64, 640>}, {transform_indices = @transform_2, window_bounds = array<i64: 1, 640>}, {transform_indices = @transform_3, window_bounds = array<i64: 16, 640>}]} {
    %c0 = arith.constant 0 : index
    %c0_0 = arith.constant 0 : index
    %0 = vector.load %arg2[%c0, %c0_0] : memref<16x64xf32, #tpu.memory_space<vmem>>, vector<16x64xf32>
    %1 = arith.negf %0 : vector<16x64xf32>
    %2 = math.exp %1 : vector<16x64xf32>
    %cst = arith.constant 1.000000e+00 : f32
    %3 = vector.broadcast %cst : f32 to vector<16x64xf32>
    %4 = arith.addf %3, %2 : vector<16x64xf32>
    %5 = arith.divf %3, %4 : vector<16x64xf32>
    %6 = arith.mulf %0, %5 : vector<16x64xf32>
    %7 = arith.truncf %6 : vector<16x64xf32> to vector<16x64xbf16>
    %c0_1 = arith.constant 0 : index
    %c0_2 = arith.constant 0 : index
    %8 = vector.load %arg3[%c0_1, %c0_2] : memref<64x640xbf16, #tpu.memory_space<vmem>>, vector<64x640xbf16>
    %cst_3 = arith.constant dense<0.000000e+00> : vector<16x640xf32>
    %9 = tpu.matmul %7, %8, %cst_3 {dimension_numbers = #tpu.dot_dimension_numbers<[1], [0], [0], [1], [0, 0, 1, 1], [], []>} : vector<16x64xbf16>, vector<64x640xbf16>, vector<16x640xf32> -> vector<16x640xf32>
    %c0_4 = arith.constant 0 : index
    %c0_5 = arith.constant 0 : index
    %10 = vector.load %arg4[%c0_4, %c0_5] : memref<1x640xf32, #tpu.memory_space<vmem>>, vector<1x640xf32>
    %11 = vector.broadcast %10 : vector<1x640xf32> to vector<16x640xf32>
    %12 = arith.addf %9, %11 : vector<16x640xf32>
    %c0_6 = arith.constant 0 : index
    %c0_7 = arith.constant 0 : index
    %13 = vector.load %arg5[%c0_6, %c0_7] : memref<16x640xf32, #tpu.memory_space<vmem>>, vector<16x640xf32>
    tpu.vector_store %arg5[%c0_6, %c0_7], %12 {strides = array<i32>} : memref<16x640xf32, #tpu.memory_space<vmem>>, vector<16x640xf32>,
    return
  }
  func.func @transform_0(%arg0: i32, %arg1: i32) -> (i32, i32) {
    %c0_i32 = arith.constant 0 : i32
    %c0_i32_0 = arith.constant 0 : i32
    return %arg1, %c0_i32 : i32, i32
  }
  func.func @transform_1(%arg0: i32, %arg1: i32) -> (i32, i32) {
    %c0_i32 = arith.constant 0 : i32
    %c0_i32_0 = arith.constant 0 : i32
    return %c0_i32, %arg0 : i32, i32
  }
  func.func @transform_2(%arg0: i32, %arg1: i32) -> (i32, i32) {
    %c0_i32 = arith.constant 0 : i32
    %c0_i32_0 = arith.constant 0 : i32
    return %c0_i32, %arg0 : i32, i32
  }
  func.func @transform_3(%arg0: i32, %arg1: i32) -> (i32, i32) {
    %c0_i32 = arith.constant 0 : i32
    return %arg1, %arg0 : i32, i32
  }
}

</mosaic_0001>

<bundles_post_ra>
// kernel: tpu_custom_call.1
= control target key start
LH: loop header
LB: loop body
LE: loop exit
PB: predicated region body
PF: predicated region fallthrough
CT: control target
= control target key end

     0   :  { %s1397_s0 = inlined_call_operand.hbm [shape: f32[16,64], index: 0, kind: input, shape index: {}]   ;;  %s1398_s1 = inlined_call_operand.hbm [shape: bf16[64,1280], index: 1, kind: input, shape index: {}]   ;;  %s1399_s2 = inlined_call_operand.hbm [shape: f32[1,1280], index: 2, kind: input, shape index: {}]   ;;  %s1400_s3 = inlined_call_operand.hbm [shape: f32[16,1280], index: 3, kind: output, shape index: {}]  }
   0x1   :  { %1409 = sst [smem:[#allocation13_spill]] %s1398_s1 }
   0x2   :  { %8 = vsyncpa [#allocation3], 0 }
   0x3   :  { %9 = vsyncpa [#allocation6], 0 }
   0x4   :  { %11 = vsyncpa [#allocation6 + $0x1], 0 }
   0x5   :  { %12 = vsyncpa [#allocation4], 0 }
   0x6   :  { %14 = vsyncpa [#allocation4 + $0x1], 0  ;;  %s1113_s12 = smov 0   ;;  %s1115_s13 = smov 0  }
   0x7   :  { %s1117_s14 = smov 0   ;;  %s1119_s15 = smov 0  }
   0x8   :  { %s1121_s16 = smov 0   ;;  %s1123_s17 = smov 0  }
   0x9 LB: > { %s32_s18 = sadd.s32 1, %s1072_s16  ;;  %s65_s19 = sadd.s32 1, %s1064_s14  ;;  %s1076_s17 = sphi %s1123_s17, %s20_s17   ;;  %s1072_s16 = sphi %s1121_s16, %s1433_s16   ;;  %s1068_s15 = sphi %s1119_s15, %s1432_s15   ;;  %s1064_s14 = sphi %s1117_s14, %s1431_s14   ;;  %s1060_s13 = sphi %s1115_s13, %s1430_s13   ;;  %s1056_s12 = sphi %s1113_s12, %s1429_s12  }
   0xa   : > { %p34_p0 = scmp.ge.s32.totalorder %s32_s18, 2  ;;  %p72_p1 = scmp.ne.s32.totalorder %s1064_s14, %s1060_s13 }
   0xb   : > { %p73_p2 = scmp.eq.s32.totalorder %s1076_s17, 0  ;;  %p803_p5 = scmp.lt.s32.totalorder %s1076_s17, 2 }
   0xc   : > { %s1435_s18 = smov (%p34_p0, %s32_s18), 0  ;;  %s172_s21 = sand.u32 1, %s1076_s17  }
   0xd   : > { %1410 = sst [smem:[#allocation12_spill]] %s1435_s18  ;;  %p74_p4 = por %p73_p2, %p72_p1 }
   0xe   : > { %s62_s20 = ssub.s32 %s1072_s16, %s1435_s18  ;;  %s174_s22 = sand.u32 1, %s1064_s14  }
   0xf   : > { %p63_p6 = scmp.eq.s32.totalorder %s62_s20, 0  ;;  %s752_s23 = smul.u32 320, %s1072_s16 }
  0x10   : > { %s772_s25 = smul.u32 160, %s174_s22  ;;  %s1411_s1 = sld [smem:[#allocation13_spill]] }
  0x11   : > { %s1161_s24 = scalar_select %p63_p6, %s1064_s14, %s65_s19  }
  0x12   : > { %p1170_p7 = pnand %p803_p5, %p74_p4  ;;  %s176_s30 = scalar_lea.vmem [#allocation5], %s772_s25 }
  0x13   : > { %s183_s4 = sshll.u32 %s176_s30, 4  ;;  %s1176_s5 = scalar_lea.sflag [#allocation6], %s172_s21  ;;  %s1174_s4 = int_to_ptr.vmem [resolvable:$true] %s183_s4 }
  0x14   : > { %s1412_s29 = scalar_select %p1170_p7, 1, 0 }
  0x15   : > { %p1403_p9 = pneg %p1170_p7 }
  0x16   : > { %s1168_s28 = scalar_lea.hbm %s1411_s1, %s752_s23  ;;  %s907_s9 = scalar_lea.hbm %s1411_s1, 5120 }
  0x17   : > { %s902_s6 = scalar_lea.hbm %s1168_s28, 2560  ;;  %p908_p12 = scmp.lt.u32.totalorder %s1168_s28, %s1411_s1 }
  0x18   : > { %p903_p8 = scmp.ne.s32.totalorder %s1168_s28, %s902_s6  ;;  %p909_p13 = scmp.lt.u32.totalorder %s907_s9, %s902_s6 }
  0x19   : > { %p911_p2 = scmp.lt.u32.totalorder %s902_s6, %s1168_s28 }
  0x1a   : > { %p905_p10 = pnand %p1403_p9, %p903_p8  ;;  %p910_p0 = por %p909_p13, %p908_p12 }
  0x1c   : > { %p906_p11 = pneg %p905_p10  ;;  %p912_p4 = por %p911_p2, %p910_p0 }
  0x1e   : > { %p913_p5 = pnand %p912_p4, %p906_p11 }
  0x20   : > { %916 = shalt.err (!%p913_p5)
}
  0x21   : > { %s917_s19 = scalar_lea.vmem %s1174_s4, 2560  ;;  %s1078_s20 = smov [#allocation5]  }
  0x22   : > { %p918_p6 = scmp.ne.s32.totalorder %s1174_s4, %s917_s19  ;;  %s922_s21 = sshll.u32 %s1078_s20, 4  ;;  %s923_s21 = int_to_ptr.vmem [resolvable:$false] %s922_s21 }
  0x23   : > { %s924_s23 = scalar_lea.vmem %s923_s21, 5120  ;;  %p925_p3 = scmp.lt.s32.totalorder %s1174_s4, %s923_s21 }
  0x24   : > { %p920_p8 = pnand %p918_p6, %p1403_p9  ;;  %p926_p12 = scmp.lt.s32.totalorder %s924_s23, %s917_s19 }
  0x26   : > { %p921_p10 = pneg %p920_p8  ;;  %p927_p13 = por %p926_p12, %p925_p3 }
  0x28   : > { %p928_p0 = pnand %p927_p13, %p921_p10 }
  0x2a   : > { %931 = shalt.err (!%p928_p0)
}
  0x2b   : > { %s1079_s25 = smov 640   ;;  %s1080_s26 = smov 320  }
  0x2c   : > { %s1081_s27 = smov 20   ;;  %s1205_s30 = sadd.s32 4294967295, %s1076_s17  }
  0x2d   : > { %794 = dma.hbm_to_vmem [thread:$0]  (!%p1170_p7), %s1168_s28, 2560, %s1174_s4, %s1176_s5, %s1079_s25, %s1080_s26, %s1081_s27  }
  0x2e   : > { %s716_s6 = sadd.s32 4294967294, %s1076_s17   ;;  %p78_p3 = scmp.ne.s32.totalorder %s1060_s13, %s1056_s12 }
  0x2f   : > { %p1402_p11 = scmp.eq.s32.totalorder %s1205_s30, 0  ;;  %p130_p2 = scmp.eq.s32.totalorder %s1205_s30, 1 }
  0x30   : > { %p136_p4 = scmp.eq.s32.totalorder %s716_s6, 1  ;;  %p717_p6 = scmp.ge.s32.totalorder %s1076_s17, 1 }
  0x31   : > { %p1214_p5 = por %p1402_p11, %p78_p3  ;;  %p1222_p8 = por %p130_p2, %p72_p1 }
  0x32   : > { %p1226_p10 = por %p136_p4, %p78_p3  ;;  %p143_p12 = scmp.lt.s32.totalorder %s1076_s17, 3 }
  0x33   : > { %s1413_s7 = scalar_select %p1214_p5, 1, 0 }
  0x34   : > { %s1414_s28 = scalar_select %p1222_p8, 1, 0 }
  0x35   : > { %s1415_s4 = scalar_select %p1226_p10, 1, 0 }
  0x36   : > { %p1231_p13 = pnand %p717_p6, %p143_p12  ;;  %s1082_s9 = smov [#allocation2]  }
  0x37   : > { %s158_s10 = sshll.u32 %s1082_s9, 4  ;;  %s773_s11 = smul.u32 5, %s174_s22  ;;  %s1235_s10 = int_to_ptr.vmem [resolvable:$true] %s158_s10 }
  0x38   : > { %s1416_s8 = scalar_select %p1231_p13, 1, 0 }
  0x39   : > { %p787_p0 = pneg %p1231_p13  ;;  %s753_s19 = smul.u32 80, %s1072_s16 }
  0x3a   : > { %s197_s26 = scalar_lea.vmem [#allocation7], %s773_s11  ;;  %s932_s22 = scalar_lea.hbm %s1397_s0, 256 }
  0x3b   : > { %p1244_p1 = pnand %p787_p0, %p1402_p11  ;;  %s1251_s25 = scalar_lea.hbm %s1399_s2, %s753_s19 }
  0x3c   : > { %s205_s27 = sshll.u32 %s197_s26, 4  ;;  %p933_p3 = scmp.ne.s32.totalorder %s1397_s0, %s932_s22  ;;  %s1253_s27 = int_to_ptr.vmem [resolvable:$true] %s205_s27 }
  0x3d   : > { %p934_p2 = pneg %p1244_p1  ;;  %p939_p12 = scmp.lt.u32.totalorder %s932_s22, %s1397_s0 }
  0x3f   : > { %p935_p4 = pnand %p934_p2, %p933_p3 }
  0x41   : > { %p936_p6 = pneg %p935_p4 }
  0x43   : > { %p941_p0 = pnand %p939_p12, %p936_p6 }
  0x45   : > { %944 = shalt.err (!%p941_p0)
}
  0x46   : > { %s945_s11 = scalar_lea.vmem %s1235_s10, 256  ;;  %p953_p8 = scmp.lt.s32.totalorder %s1235_s10, %s1235_s10 }
  0x47   : > { %p946_p11 = scmp.ne.s32.totalorder %s1235_s10, %s945_s11  ;;  %p954_p5 = scmp.lt.s32.totalorder %s945_s11, %s945_s11 }
  0x49   : > { %p948_p9 = pnand %p946_p11, %p934_p2  ;;  %p955_p13 = por %p954_p5, %p953_p8 }
  0x4b   : > { %p949_p10 = pneg %p948_p9 }
  0x4d   : > { %p956_p7 = pnand %p955_p13, %p949_p10 }
  0x4f   : > { %959 = shalt.err (!%p956_p7)
}
  0x50   : > { %s1083_s1 = smov 128   ;;  %s1084_s18 = smov 8  }
  0x51   : > { %790 = dma.hbm_to_vmem [thread:$0]  (!%p1244_p1), %s1397_s0, 256, %s1235_s10, [#allocation3], %s1083_s1, %s1083_s1, %s1084_s18  }
  0x52   : > { %s960_s6 = scalar_lea.hbm %s1251_s25, 80  ;;  %p1418_p11 = scmp.ne.s32.totalorder %s1412_s29, 0 }
  0x53   : > { %p961_p9 = scmp.ne.s32.totalorder %s1251_s25, %s960_s6  ;;  %s965_s21 = scalar_lea.hbm %s1399_s2, 160 }
  0x54   : > { %p1419_p5 = pneg %p1418_p11  ;;  %p966_p10 = scmp.lt.u32.totalorder %s1251_s25, %s1399_s2 }
  0x55   : > { %p967_p13 = scmp.lt.u32.totalorder %s965_s21, %s960_s6  ;;  %p969_p2 = scmp.lt.u32.totalorder %s960_s6, %s1251_s25 }
  0x56   : > { %p963_p8 = pnand %p961_p9, %p1419_p5 }
  0x57   : > { %p968_p3 = por %p967_p13, %p966_p10 }
  0x58   : > { %p964_p7 = pneg %p963_p8 }
  0x59   : > { %p970_p4 = por %p969_p2, %p968_p3 }
  0x5b   : > { %p971_p6 = pnand %p970_p4, %p964_p7 }
  0x5d   : > { %974 = shalt.err (!%p971_p6)
}
  0x5e   : > { %s975_s10 = scalar_lea.vmem %s1253_s27, 80  ;;  %p1420_p12 = pmov %p1419_p5 }
  0x5f   : > { %p976_p1 = scmp.ne.s32.totalorder %s1253_s27, %s975_s10  ;;  %s1085_s20 = smov [#allocation7]  }
  0x60   : > { %s980_s1 = sshll.u32 %s1085_s20, 4  ;;  %s981_s1 = int_to_ptr.vmem [resolvable:$false] %s980_s1 }
  0x61   : > { %p978_p0 = pnand %p976_p1, %p1420_p12  ;;  %s982_s18 = scalar_lea.vmem %s981_s1, 160 }
  0x62   : > { %p983_p5 = scmp.lt.s32.totalorder %s1253_s27, %s981_s1  ;;  %p984_p8 = scmp.lt.s32.totalorder %s982_s18, %s975_s10 }
  0x63   : > { %p979_p9 = pneg %p978_p0 }
  0x64   : > { %p985_p10 = por %p984_p8, %p983_p5 }
  0x66   : > { %p986_p13 = pnand %p985_p10, %p979_p9 }
  0x68   : > { %989 = shalt.err (!%p986_p13)
}
  0x69   : > { %797 = dma.hbm_to_vmem [thread:$0]  (!%p1418_p11), %s1251_s25, 80, %s1253_s27, %s1176_s5  }
  0x6a   : > { %p1421_p7 = scmp.ne.s32.totalorder %s1416_s8, 0 }
  0x6b   : > { %p1422_p3 = scmp.eq.s32.totalorder (!%p1421_p7), %s1205_s30, 0 }
  0x6c   : > { %214 = sbr.rel (%p1421_p7) target bundleno = 404 (0x194), region = 32 }
  0x73   : > { %1043 = dma.done.wait (%p1422_p3), [#allocation3], 256   ;;  %p1423_p2 = pmov %p1422_p3 }
  0x74   : > { %s220_s19 = sand.u32 1, %s1205_s30   ;;  %s1308_s26 = sand.u32 1, %s1060_s13  }
  0x75   : > { %1045 = vsyncadd (%p1423_p2), [#allocation3], 4294967040  ;;  %s774_s29 = smul.u32 160, %s1308_s26  ;;  %s221_s6 = scalar_lea.sflag [#allocation6], %s220_s19 }
  0x76   : > { %p1424_p11 = scmp.ne.s32.totalorder %s1413_s7, 0 }
  0x77   : > { %s1311_s9 = scalar_lea.vmem [#allocation5], %s774_s29 }
  0x78   : > { %1047 = dma.done.wait (%p1424_p11), %s221_s6, 2640  }
  0x79   : > { %1049 = vsyncadd (%p1424_p11), %s221_s6, 4294964656  ;;  %v1086_v0 = vmov 0   ;;  %v866_v1 = vld [vmem:[%s1311_s9 + $0x4] ss:$20 sps:$4 sm:$0xff]   ;;  %v868_v2 = vld [vmem:[%s1311_s9] ss:$20 sps:$4 sm:$0xff]   ;;  %v310_v35 = vlaneseq }
  0x7a   : > { %475 = vmatprep.mubr.bf16.mxu0 %v1086_v0  ;;  %518 = vmatprep.mubr.bf16.mxu1 %v1086_v0  ;;  %v869_v3 = vld [vmem:[%s1311_s9 + $0x2c] ss:$20 sps:$4 sm:$0xff]   ;;  %v871_v4 = vld [vmem:[%s1311_s9 + $0x28] ss:$20 sps:$4 sm:$0xff]   ;;  %v874_v6 = vld [vmem:[%s1311_s9 + $0x50] ss:$20 sps:$4 sm:$0xff]  }
  0x7b   : > { %443 = vmatprep.subr.bf16.mxu0 %v866_v1  ;;  %v872_v5 = vld [vmem:[%s1311_s9 + $0x54] ss:$20 sps:$4 sm:$0xff]   ;;  %v877_v7 = vld [vmem:[%s1311_s9 + $0xc] ss:$20 sps:$4 sm:$0xff]   ;;  %v875_v8 = vld [vmem:[%s1311_s9 + $0x7c] ss:$20 sps:$4 sm:$0xff]  }
  0x7c   : > { %444 = vmatpush1.bf16.msra.mxu0 %v868_v2  ;;  %v880_v9 = vld [vmem:[%s1311_s9 + $0x8] ss:$20 sps:$4 sm:$0xff]   ;;  %486 = vmatprep.subr.bf16.mxu1 %v877_v7  ;;  %v267_v11 = vld [vmem:[#allocation2] sm:$0xff]  ;;  %v879_v17 = vld [vmem:[%s1311_s9 + $0x78] ss:$20 sps:$4 sm:$0xff]   ;;  %v1087_v20 = vmov 0.0  }
  0x7d   : > { %445 = vmatprep.subr.bf16.mxu0 %v869_v3  ;;  %v881_v10 = vld [vmem:[%s1311_s9 + $0x34] ss:$20 sps:$4 sm:$0xff]   ;;  %487 = vmatpush1.bf16.msra.mxu1 %v880_v9  ;;  %v268_v12 = vld [vmem:[#allocation2 + $0x8] sm:$0xff]  ;;  %v724_v13 = vmul.f32 -1.442695, %v267_v11  ;;  %vm439_vm0 = vcmask 523264  }
  0x7e   : > { %v883_v14 = vld [vmem:[%s1311_s9 + $0x30] ss:$20 sps:$4 sm:$0xff]   ;;  %488 = vmatprep.subr.bf16.mxu1 %v881_v10  ;;  %v725_v15 = vmul.f32 -1.442695, %v268_v12  ;;  %v887_v18 = vld [vmem:[%s1311_s9 + $0x58] ss:$20 sps:$4 sm:$0xff]  }
  0x7f   : > { %894 = vpow2.f32 %v724_v13  ;;  %v885_v16 = vld [vmem:[%s1311_s9 + $0x5c] ss:$20 sps:$4 sm:$0xff]   ;;  %v889_v19 = vld [vmem:[%s1311_s9 + $0x84] ss:$20 sps:$4 sm:$0xff]   ;;  %v891_v21 = vld [vmem:[%s1311_s9 + $0x80] ss:$20 sps:$4 sm:$0xff]  }
  0x80   : > { %446 = vmatpush1.bf16.msra.mxu0 %v871_v4  ;;  %896 = vpow2.f32 %v725_v15  ;;  %v884_v30 = vld [vmem:[%s1311_s9 + $0x10] ss:$20 sps:$4 sm:$0xff]   ;;  %v888_v32 = vld [vmem:[%s1311_s9 + $0x38] ss:$20 sps:$4 sm:$0xff]   ;;  %vm1088_vm1 = vmmov 0   ;;  %s775_s5 = smul.u32 5, %s1308_s26 }
  0x81   : > { %447 = vmatprep.subr.bf16.mxu0 %v872_v5  ;;  %489 = vmatpush1.bf16.msra.mxu1 %v883_v14  ;;  %v892_v33 = vld [vmem:[%s1311_s9 + $0x60] ss:$20 sps:$4 sm:$0xff]   ;;  %v893_v34 = vld [vmem:[%s1311_s9 + $0x88] ss:$20 sps:$4 sm:$0xff]   ;;  %v311_v36 = vshrl.u32 %v310_v35, 7  ;;  %s776_s7 = smul.u32 80, %s1308_s26 }
  0x82   : > { %490 = vmatprep.subr.bf16.mxu1 %v885_v16  ;;  %s233_s30 = scalar_lea.vmem [#allocation7], %s775_s5  ;;  %s754_s27 = smul.u32 640, %s1068_s15 }
  0x83   : > { %v312_v37 = vsub.s32 0, %v311_v36  ;;  %v320_v38 = vsub.s32 2, %v311_v36  ;;  %v308_v39 = vld [vmem:[%s233_s30] sm:$0x1f]  ;;  %v316_v40 = vsub.s32 1, %v311_v36  ;;  %v324_v41 = vsub.s32 3, %v311_v36 }
  0x84   : > { %448 = vmatpush1.bf16.msra.mxu0 %v874_v6  ;;  %s260_s8 = scalar_lea.vmem [#allocation8], %s776_s7  ;;  %v328_v62 = vsub.s32 4, %v311_v36  ;;  %s1348_s23 = scalar_lea.hbm %s1400_s3, %s754_s27 }
  0x85   : > { %449 = vmatprep.subr.bf16.mxu0 %v875_v8  ;;  %491 = vmatpush1.bf16.msra.mxu1 %v887_v18  ;;  %v313_v42 = vrot.slane %v308_v39, %v312_v37  ;;  %v321_v43 = vrot.slane %v308_v39, %v320_v38  ;;  %v317_v44 = vrot.slane %v308_v39, %v316_v40  ;;  %s597_s25 = sshll.u32 %s260_s8, 4  ;;  %s581_s11 = scalar_lea.sflag [#allocation4], %s1308_s26  ;;  %s1343_s25 = int_to_ptr.vmem [resolvable:$true] %s597_s25 }
  0x86   : > { %492 = vmatprep.subr.bf16.mxu1 %v889_v19  ;;  %v325_v45 = vrot.slane %v308_v39, %v324_v41  ;;  %v329_v63 = vrot.slane %v308_v39, %v328_v62  ;;  %s990_s15 = scalar_lea.vmem %s1343_s25, 1280  ;;  %p1425_p6 = scmp.ne.s32.totalorder %s1414_s28, 0 }
  0x87   : > { %p991_p4 = scmp.ne.s32.totalorder %s1343_s25, %s990_s15  ;;  %s1089_s10 = smov [#allocation8]  }
  0x88   : > { %450 = vmatpush1.bf16.msra.mxu0 %v879_v17  ;;  %s994_s20 = sshll.u32 %s1089_s10, 4  ;;  %s995_s20 = int_to_ptr.vmem [resolvable:$false] %s994_s20 }
  0x89   : > { %760 = vmatprep.subr.bf16.mxu0 %v1087_v20  ;;  %v895_v22 = vpop.eup %894  ;;  %493 = vmatpush1.bf16.msra.mxu1 %v891_v21  ;;  %p992_p1 = pnand %p991_p4, %p1425_p6  ;;  %s996_s1 = scalar_lea.vmem %s995_s20, 2560 }
  0x8a   : > { %v897_v23 = vpop.eup %896  ;;  %v275_v24 = vadd.f32 1.0, %v895_v22  ;;  %p997_p0 = scmp.lt.s32.totalorder %s1343_s25, %s995_s20  ;;  %p998_p9 = scmp.lt.s32.totalorder %s996_s1, %s990_s15 }
  0x8b   : > { %v276_v25 = vadd.f32 1.0, %v897_v23  ;;  %p993_p12 = pneg %p992_p1 }
  0x8c   : > { %898 = vrcp.f32 %v275_v24  ;;  %p999_p5 = por %p998_p9, %p997_p0 }
  0x8d   : > { %900 = vrcp.f32 %v276_v25 }
  0x8e   : > { %p1000_p8 = pnand %p999_p5, %p993_p12 }
  0x96   : > { %v899_v26 = vpop.eup %898 }
  0x97   : > { %v901_v27 = vpop.eup %900  ;;  %v281_v28 = vmul.f32 %v899_v26, %v267_v11 }
  0x98   : > { %v282_v29 = vmul.f32 %v901_v27, %v268_v12 }
  0x9a   : > { %v283_v31 = vpack.c.bf16 %v282_v29, %v281_v28 }
  0x9c   : > { %746 = vmatmul.mubr.msk.bf16.vlgmr.msra.gmra.mrb[0].mxu0 %vm439_vm0, %v283_v31  ;;  %747 = vmatmul.mubr.msk.bf16.vlgmr.msra.gmra.mrb[0].mxu1 %vm439_vm0, %v283_v31 }
  0x9d   : > { %761 = vmatpush3.bf16.msra.mxu0 %v884_v30  ;;  %768 = vmatprep.mubr.msk.bf16.mxu0 %vm1088_vm1, %v1087_v20 }
  0x9e   : > { %762 = vmatprep.subr.bf16.mxu0 %v1087_v20 }
  0xa1   : > { %763 = vmatpush3.bf16.msra.mxu0 %v888_v32 }
  0xa2   : > { %764 = vmatprep.subr.bf16.mxu0 %v1087_v20 }
  0xa5   : > { %765 = vmatpush3.bf16.msra.mxu0 %v892_v33 }
  0xa6   : > { %766 = vmatprep.subr.bf16.mxu0 %v1087_v20 }
  0xa9   : > { %767 = vmatpush3.bf16.msra.mxu0 %v893_v34 }
  0xac   : > { %769 = vmatmul.mubr.msk.bf16.vlgmr.msra.gmra.mrb[4].mxu0 %vm439_vm0, %v283_v31 }
 0x16f   : > { %v477_v46 = vpop.f32.mrb[0].mxu0  ;;  %v520_v47 = vpop.f32.mrb[0].mxu1 }
 0x170   : > { %v478_v48 = vadd.f32 %v477_v46, %v313_v42  ;;  %v479_v49 = vpop.f32.mrb[1].mxu0  ;;  %v521_v50 = vadd.f32 %v520_v47, %v321_v43  ;;  %v522_v51 = vpop.f32.mrb[1].mxu1 }
 0x171   : > { %v480_v52 = vadd.f32 %v479_v49, %v317_v44  ;;  %v481_v53 = vpop.f32.mrb[2].mxu0  ;;  %v523_v54 = vadd.f32 %v522_v51, %v325_v45  ;;  %v524_v55 = vpop.f32.mrb[2].mxu1 }
 0x172   : > { %570 = vst [vmem:[%s260_s8] sm:$0xff] %v478_v48  ;;  %v482_v56 = vadd.f32 %v481_v53, %v313_v42  ;;  %v483_v57 = vpop.f32.mrb[3].mxu0  ;;  %572 = vst [vmem:[%s260_s8 + $0x10] sm:$0xff] %v521_v50  ;;  %v525_v58 = vadd.f32 %v524_v55, %v321_v43  ;;  %v526_v59 = vpop.f32.mrb[3].mxu1 }
 0x173   : > { %571 = vst [vmem:[%s260_s8 + $0x8] sm:$0xff] %v480_v52  ;;  %v484_v60 = vadd.f32 %v483_v57, %v317_v44  ;;  %573 = vst [vmem:[%s260_s8 + $0x18] sm:$0xff] %v523_v54  ;;  %v527_v61 = vadd.f32 %v526_v59, %v325_v45 }
 0x174   : > { %575 = vst [vmem:[%s260_s8 + $0x28] sm:$0xff] %v482_v56  ;;  %577 = vst [vmem:[%s260_s8 + $0x38] sm:$0xff] %v525_v58 }
 0x175   : > { %576 = vst [vmem:[%s260_s8 + $0x30] sm:$0xff] %v484_v60  ;;  %578 = vst [vmem:[%s260_s8 + $0x40] sm:$0xff] %v527_v61 }
 0x17f   : > { %v563_v0 = vpop.f32.mrb[4].mxu0 }
 0x180   : > { %v564_v1 = vadd.f32 %v563_v0, %v329_v63  ;;  %v770_v2 = vpop.f32.mrb[5].mxu0 }
 0x181   : > { %v566_v3 = vpop.f32.mrb[6].mxu0 }
 0x182   : > { %574 = vst [vmem:[%s260_s8 + $0x20] sm:$0xff] %v564_v1  ;;  %v567_v4 = vadd.f32 %v566_v3, %v329_v63  ;;  %v771_v5 = vpop.f32.mrb[7].mxu0 }
 0x184   : > { %579 = vst [vmem:[%s260_s8 + $0x48] sm:$0xff] %v567_v4 }
 0x185   : > { %1003 = shalt.err (!%p1000_p8)
}
 0x186   : > { %s1004_s18 = scalar_lea.hbm %s1348_s23, 1280  ;;  %s1008_s6 = scalar_lea.hbm %s1400_s3, 2560 }
 0x187   : > { %p1005_p10 = scmp.ne.s32.totalorder %s1348_s23, %s1004_s18  ;;  %p1009_p3 = scmp.lt.u32.totalorder %s1348_s23, %s1400_s3 }
 0x188   : > { %p1010_p2 = scmp.lt.u32.totalorder %s1008_s6, %s1004_s18  ;;  %p1012_p4 = scmp.lt.u32.totalorder %s1004_s18, %s1348_s23 }
 0x189   : > { %p1006_p13 = pnand %p1005_p10, %p1425_p6 }
 0x18a   : > { %p1011_p11 = por %p1010_p2, %p1009_p3 }
 0x18b   : > { %p1007_p7 = pneg %p1006_p13 }
 0x18c   : > { %p1013_p1 = por %p1012_p4, %p1011_p11 }
 0x18e   : > { %p1014_p12 = pnand %p1013_p1, %p1007_p7 }
 0x190   : > { %1017 = shalt.err (!%p1014_p12)
}
 0x191   : > { %s1090_s30 = smov 640   ;;  %s1091_s7 = smov 1280  }
 0x192   : > { %s1092_s8 = smov 40  }
 0x193   : > { %785 = dma.vmem_to_hbm [thread:$0]  (%p1425_p6), %s1343_s25, 1280, %s1348_s23, %s581_s11, %s1090_s30, %s1091_s7, %s1092_s8  }
 0x194 PF: > { %s612_s27 = sand.u32 1, %s1056_s12   ;;  %p1426_p0 = scmp.ne.s32.totalorder %s1415_s4, 0 }
 0x195   : > { %p1427_p9 = scmp.ge.s32.totalorder %s1076_s17, 2  ;;  %s613_s22 = scalar_lea.sflag [#allocation4], %s612_s27 }
 0x197   : > { %p799_p5 = pnand %p1427_p9, %p1426_p0 }
 0x199   : > { %1051 = dma.done.wait (!%p799_p5), %s613_s22, 1280  }
 0x19a   : > { %1053 = vsyncadd (!%p799_p5), %s613_s22, 4294966016  ;;  %s20_s17 = sadd.s32 1, %s1076_s17   ;;  %s1428_s28 = sld [smem:[#allocation12_spill]] }
 0x19b   : > { %p17_p8 = scmp.ge.s32.totalorder %s20_s17, 4   ;;  %s1429_s12 = smov %s1060_s13 }
 0x19c   : > { %s1430_s13 = smov %s1064_s14  ;;  %s1431_s14 = smov %s1161_s24 }
 0x19d   : > { %s1432_s15 = smov %s1072_s16  ;;  %19 = sbr.rel (!%p17_p8) target bundleno = 9 (0x9), region = 94 }
 0x1a0   : > { %s1433_s16 = smov %s1428_s28 }
 0x1a4   :  { %618 = vsyncpa [#allocation3], 1 }
 0x1a5   :  { %620 = vsyncpa [#allocation3 + $0x1], 1 }
 0x1a6   :  { %621 = vsyncpa [#allocation6], 1 }
 0x1a7   :  { %623 = vsyncpa [#allocation6 + $0x1], 1 }
 0x1a8   :  { %624 = vsyncpa [#allocation4], 1 }
 0x1a9   :  { %626 = vsyncpa [#allocation4 + $0x1], 1 }

</bundles_post_ra>
